<compile_context>
chip_gen: v7x
topology: tpu7x:2x2x1
jax: 0.10.0
libtpu: 0.0.40
codegen_flags: <defaults>
</compile_context>

<pallas_src>
import functools

import jax
import jax.numpy as jnp
from jax.experimental import pallas as pl
from jax.experimental.pallas import tpu as pltpu

LANE = 128        # feature dim padded to a multiple of this (lane-dense)
TILE_ROWS = 16    # batch-tile granularity (bf16 sublane packing: 16 rows/vreg)
MAX_TB = 1024     # max rows per batch tile


def _round_up(x, m):
    return (x + m - 1) // m * m


def _softplus(x):
    # numerically stable softplus: max(x, 0) + log1p(exp(-|x|))
    return jnp.maximum(x, 0.0) + jnp.log1p(jnp.exp(-jnp.abs(x)))


def prior_kernel(s_ref,
                 w1_ref, b1_ref,
                 w2_ref, b2_ref,
                 w3_ref, b3_ref,
                 wh_ref, bh_ref,
                 out_ref):
    P = s_ref.shape[-1]
    x = s_ref[...]                                   # already bf16

    h = jnp.dot(x, w1_ref[...], preferred_element_type=jnp.float32) + b1_ref[...]
    h = jnp.maximum(h, 0.0).astype(jnp.bfloat16)
    h = jnp.dot(h, w2_ref[...], preferred_element_type=jnp.float32) + b2_ref[...]
    h = jnp.maximum(h, 0.0).astype(jnp.bfloat16)
    h = jnp.dot(h, w3_ref[...], preferred_element_type=jnp.float32) + b3_ref[...]
    h = jnp.maximum(h, 0.0).astype(jnp.bfloat16)

    # fused heads: [ mu | pre_sigma ] in one (TB, 2P) matmul, stored as one slab
    heads = jnp.dot(h, wh_ref[...], preferred_element_type=jnp.float32) + bh_ref[...]
    out_ref[:, :P] = heads[:, :P].astype(out_ref.dtype)                 # mu
    out_ref[:, P:] = (1e-6 + _softplus(heads[:, P:])).astype(out_ref.dtype)  # sigma


def prepare_kernel_params(params, s_dim):
    """Pad feature dims to a multiple of 128 (lane-dense), cast weights to bf16,
    and fuse the two head layers into a single (P, 2P) weight / (1, 2P) bias."""
    P = _round_up(max(s_dim, LANE), LANE)

    def pad_w(w):
        return jnp.pad(w, ((0, P - s_dim), (0, P - s_dim))).astype(jnp.bfloat16)

    def pad_b(b):
        return jnp.pad(b, ((0, 0), (0, P - s_dim))).astype(jnp.float32)

    w_heads = jnp.concatenate([pad_w(params["wmu"]), pad_w(params["wsig"])], axis=1)
    b_heads = jnp.concatenate([pad_b(params["bmu"]), pad_b(params["bsig"])], axis=1)
    return dict(
        w1=pad_w(params["w1"]), b1=pad_b(params["b1"]),
        w2=pad_w(params["w2"]), b2=pad_b(params["b2"]),
        w3=pad_w(params["w3"]), b3=pad_b(params["b3"]),
        w_heads=w_heads, b_heads=b_heads,
    )


@functools.partial(jax.jit, static_argnums=(2,))
def prior_forward(s, kparams, s_dim):
    """Run the Prior forward pass. Returns (mu_s, sigma_s), each (B, s_dim) f32."""
    B = s.shape[0]
    P = kparams["w1"].shape[0]          # padded feature dim (static)

    # --- batch tiling: pad B to the 16-row granularity, pick n_blocks first
    # (>= 2 and even when possible so both v7x cores get work), then TB.
    B_min = _round_up(max(B, TILE_ROWS), TILE_ROWS)
    n_blocks = max(pl.cdiv(B_min, MAX_TB), 2 if B_min >= 2 * TILE_ROWS else 1)
    if n_blocks > 1:
        n_blocks = _round_up(n_blocks, 2)
    TB = _round_up(pl.cdiv(B_min, n_blocks), TILE_ROWS)
    B_pad = TB * n_blocks

    # bf16 input tile (cast fuses with the pad under jit): halves input DMA bytes.
    s_p = jnp.pad(s.astype(jnp.bfloat16), ((0, B_pad - B), (0, P - s_dim)))

    in_tile_spec = pl.BlockSpec((TB, P), lambda i: (i, 0))
    out_tile_spec = pl.BlockSpec((TB, 2 * P), lambda i: (i, 0))

    def resident(a):  # whole array, same block every step -> stays in VMEM
        return pl.BlockSpec(a.shape, lambda i: (0, 0))

    args = (
        s_p,
        kparams["w1"], kparams["b1"],
        kparams["w2"], kparams["b2"],
        kparams["w3"], kparams["b3"],
        kparams["w_heads"], kparams["b_heads"],
    )
    in_specs = [in_tile_spec] + [resident(a) for a in args[1:]]

    weight_bytes = sum(int(a.size) * a.dtype.itemsize for a in args[1:])
    # double-buffered bf16 input tile + double-buffered f32 fused output slab
    tile_bytes = 2 * TB * P * 2 + 2 * TB * (2 * P) * 4
    vmem_limit = int(min(max(2 * weight_bytes + tile_bytes + (4 << 20), 16 << 20),
                         48 << 20))

    # Advisory cost estimate: 3 square matmuls + 1 fused-head matmul,
    # softplus exp/log, and *all* HBM bytes (inputs, weights, outputs).
    flops = 2 * B_pad * P * P * 3 + 2 * B_pad * P * (2 * P)
    transcendentals = 2 * B_pad * P
    bytes_accessed = (B_pad * P * 2            # bf16 input
                      + B_pad * 2 * P * 4      # f32 fused output
                      + weight_bytes)

    out = pl.pallas_call(
        prior_kernel,
        out_shape=jax.ShapeDtypeStruct((B_pad, 2 * P), jnp.float32),
        grid=(n_blocks,),
        in_specs=in_specs,
        out_specs=out_tile_spec,
        compiler_params=pltpu.CompilerParams(
            dimension_semantics=("parallel",),
            vmem_limit_bytes=vmem_limit),
        cost_estimate=pl.CostEstimate(
            flops=flops,
            transcendentals=transcendentals,
            bytes_accessed=bytes_accessed),
    )(*args)

    # Trim batch padding and padded feature lanes (padded sigma lanes hold
    # 1e-6 + log 2 and padded rows hold garbage; both dropped here). If the
    # consumer can handle padded outputs, these slices can be skipped entirely.
    mu = out[:B, :s_dim]
    sigma = out[:B, P:P + s_dim]
    return mu, sigma


def init_prior_params(key, s_dim):
    """Deterministic init mimicking PyTorch nn.Linear default
    (U[-1/sqrt(fan_in), 1/sqrt(fan_in)]), stored as (in, out) f32."""
    keys = jax.random.split(key, 10)
    bound = 1.0 / jnp.sqrt(s_dim)

    def lin(kw, kb):
        w = jax.random.uniform(kw, (s_dim, s_dim), jnp.float32, -bound, bound)
        b = jax.random.uniform(kb, (1, s_dim), jnp.float32, -bound, bound)
        return w, b

    w1, b1 = lin(keys[0], keys[1])
    w2, b2 = lin(keys[2], keys[3])
    w3, b3 = lin(keys[4], keys[5])
    wmu, bmu = lin(keys[6], keys[7])
    wsig, bsig = lin(keys[8], keys[9])
    return dict(w1=w1, b1=b1, w2=w2, b2=b2, w3=w3, b3=b3,
                wmu=wmu, bmu=bmu, wsig=wsig, bsig=bsig)


def prior_forward_ref(s, p):
    """Plain-JAX f32 reference for correctness checking."""
    h = jax.nn.relu(s @ p["w1"] + p["b1"])
    h = jax.nn.relu(h @ p["w2"] + p["b2"])
    h = jax.nn.relu(h @ p["w3"] + p["b3"])
    mu = h @ p["wmu"] + p["bmu"]
    sigma = 1e-6 + jax.nn.softplus(h @ p["wsig"] + p["bsig"])
    return mu, sigma


if __name__ == "__main__":
    key = jax.random.PRNGKey(0)
    k_params, k_s = jax.random.split(key)

    B, s_dim = 8, 32
    params = init_prior_params(k_params, s_dim)
    kparams = prepare_kernel_params(params, s_dim)
    s = jax.random.normal(k_s, (B, s_dim), jnp.float32)

    mu, sigma = prior_forward(s, kparams, s_dim)
    jax.block_until_ready((mu, sigma))

    mu_ref, sigma_ref = prior_forward_ref(s, params)
    # bf16 matmul inputs (f32 accumulation) -> ~1e-2 relative vs f32 reference;
    # this is an intentional numerics change.
    assert mu.shape == (B, s_dim) and sigma.shape == (B, s_dim)
    assert jnp.allclose(mu, mu_ref, atol=5e-2, rtol=5e-2)
    assert jnp.allclose(sigma, sigma_ref, atol=5e-2, rtol=5e-2)
    assert bool(jnp.all(sigma > 0))

    # TODO(synk): torch.distributions.Normal has no Pallas equivalent; the
    # kernel returns its defining parameters (mu_s, sigma_s) instead.
    print("KERNEL_OK")
</pallas_src>

<mosaic_0001>
module attributes {stable_mosaic.version = 11 : i64} {
  func.func @prior_kernel(%arg0: i32, %arg1: memref<16x128xbf16, #tpu.memory_space<vmem>>, %arg2: memref<128x128xbf16, #tpu.memory_space<vmem>>, %arg3: memref<1x128xf32, #tpu.memory_space<vmem>>, %arg4: memref<128x128xbf16, #tpu.memory_space<vmem>>, %arg5: memref<1x128xf32, #tpu.memory_space<vmem>>, %arg6: memref<128x128xbf16, #tpu.memory_space<vmem>>, %arg7: memref<1x128xf32, #tpu.memory_space<vmem>>, %arg8: memref<128x256xbf16, #tpu.memory_space<vmem>>, %arg9: memref<1x256xf32, #tpu.memory_space<vmem>>, %arg10: memref<16x256xf32, #tpu.memory_space<vmem>>) attributes {dimension_semantics = [#tpu.dimension_semantics<parallel>], iteration_bounds = array<i64: 1>, scalar_prefetch = 0 : i64, scratch_operands = 0 : i64, tpu.core_type = #tpu.core_type<tc>, window_params = [{transform_indices = @transform_0, window_bounds = array<i64: 16, 128>}, {pipeline_mode = #tpu.pipeline_mode<synchronous>, transform_indices = @transform_1, window_bounds = array<i64: 128, 128>}, {pipeline_mode = #tpu.pipeline_mode<synchronous>, transform_indices = @transform_2, window_bounds = array<i64: 1, 128>}, {pipeline_mode = #tpu.pipeline_mode<synchronous>, transform_indices = @transform_3, window_bounds = array<i64: 128, 128>}, {pipeline_mode = #tpu.pipeline_mode<synchronous>, transform_indices = @transform_4, window_bounds = array<i64: 1, 128>}, {pipeline_mode = #tpu.pipeline_mode<synchronous>, transform_indices = @transform_5, window_bounds = array<i64: 128, 128>}, {pipeline_mode = #tpu.pipeline_mode<synchronous>, transform_indices = @transform_6, window_bounds = array<i64: 1, 128>}, {pipeline_mode = #tpu.pipeline_mode<synchronous>, transform_indices = @transform_7, window_bounds = array<i64: 128, 256>}, {pipeline_mode = #tpu.pipeline_mode<synchronous>, transform_indices = @transform_8, window_bounds = array<i64: 1, 256>}, {transform_indices = @transform_9, window_bounds = array<i64: 16, 256>}]} {
    %c0 = arith.constant 0 : index
    %c0_0 = arith.constant 0 : index
    %0 = vector.load %arg1[%c0, %c0_0] : memref<16x128xbf16, #tpu.memory_space<vmem>>, vector<16x128xbf16>
    %c0_1 = arith.constant 0 : index
    %c0_2 = arith.constant 0 : index
    %1 = vector.load %arg2[%c0_1, %c0_2] : memref<128x128xbf16, #tpu.memory_space<vmem>>, vector<128x128xbf16>
    %cst = arith.constant dense<0.000000e+00> : vector<16x128xf32>
    %2 = tpu.matmul %0, %1, %cst {dimension_numbers = #tpu.dot_dimension_numbers<[1], [0], [0], [1], [0, 0, 1, 1], [], []>} : vector<16x128xbf16>, vector<128x128xbf16>, vector<16x128xf32> -> vector<16x128xf32>
    %c0_3 = arith.constant 0 : index
    %c0_4 = arith.constant 0 : index
    %3 = vector.load %arg3[%c0_3, %c0_4] : memref<1x128xf32, #tpu.memory_space<vmem>>, vector<1x128xf32>
    %4 = vector.broadcast %3 : vector<1x128xf32> to vector<16x128xf32>
    %5 = arith.addf %2, %4 : vector<16x128xf32>
    %cst_5 = arith.constant 0.000000e+00 : f32
    %6 = vector.broadcast %cst_5 : f32 to vector<16x128xf32>
    %7 = arith.maximumf %5, %6 : vector<16x128xf32>
    %8 = arith.truncf %7 : vector<16x128xf32> to vector<16x128xbf16>
    %c0_6 = arith.constant 0 : index
    %c0_7 = arith.constant 0 : index
    %9 = vector.load %arg4[%c0_6, %c0_7] : memref<128x128xbf16, #tpu.memory_space<vmem>>, vector<128x128xbf16>
    %cst_8 = arith.constant dense<0.000000e+00> : vector<16x128xf32>
    %10 = tpu.matmul %8, %9, %cst_8 {dimension_numbers = #tpu.dot_dimension_numbers<[1], [0], [0], [1], [0, 0, 1, 1], [], []>} : vector<16x128xbf16>, vector<128x128xbf16>, vector<16x128xf32> -> vector<16x128xf32>
    %c0_9 = arith.constant 0 : index
    %c0_10 = arith.constant 0 : index
    %11 = vector.load %arg5[%c0_9, %c0_10] : memref<1x128xf32, #tpu.memory_space<vmem>>, vector<1x128xf32>
    %12 = vector.broadcast %11 : vector<1x128xf32> to vector<16x128xf32>
    %13 = arith.addf %10, %12 : vector<16x128xf32>
    %cst_11 = arith.constant 0.000000e+00 : f32
    %14 = vector.broadcast %cst_11 : f32 to vector<16x128xf32>
    %15 = arith.maximumf %13, %14 : vector<16x128xf32>
    %16 = arith.truncf %15 : vector<16x128xf32> to vector<16x128xbf16>
    %c0_12 = arith.constant 0 : index
    %c0_13 = arith.constant 0 : index
    %17 = vector.load %arg6[%c0_12, %c0_13] : memref<128x128xbf16, #tpu.memory_space<vmem>>, vector<128x128xbf16>
    %cst_14 = arith.constant dense<0.000000e+00> : vector<16x128xf32>
    %18 = tpu.matmul %16, %17, %cst_14 {dimension_numbers = #tpu.dot_dimension_numbers<[1], [0], [0], [1], [0, 0, 1, 1], [], []>} : vector<16x128xbf16>, vector<128x128xbf16>, vector<16x128xf32> -> vector<16x128xf32>
    %c0_15 = arith.constant 0 : index
    %c0_16 = arith.constant 0 : index
    %19 = vector.load %arg7[%c0_15, %c0_16] : memref<1x128xf32, #tpu.memory_space<vmem>>, vector<1x128xf32>
    %20 = vector.broadcast %19 : vector<1x128xf32> to vector<16x128xf32>
    %21 = arith.addf %18, %20 : vector<16x128xf32>
    %cst_17 = arith.constant 0.000000e+00 : f32
    %22 = vector.broadcast %cst_17 : f32 to vector<16x128xf32>
    %23 = arith.maximumf %21, %22 : vector<16x128xf32>
    %24 = arith.truncf %23 : vector<16x128xf32> to vector<16x128xbf16>
    %c0_18 = arith.constant 0 : index
    %c0_19 = arith.constant 0 : index
    %25 = vector.load %arg8[%c0_18, %c0_19] : memref<128x256xbf16, #tpu.memory_space<vmem>>, vector<128x256xbf16>
    %cst_20 = arith.constant dense<0.000000e+00> : vector<16x256xf32>
    %26 = tpu.matmul %24, %25, %cst_20 {dimension_numbers = #tpu.dot_dimension_numbers<[1], [0], [0], [1], [0, 0, 1, 1], [], []>} : vector<16x128xbf16>, vector<128x256xbf16>, vector<16x256xf32> -> vector<16x256xf32>
    %c0_21 = arith.constant 0 : index
    %c0_22 = arith.constant 0 : index
    %27 = vector.load %arg9[%c0_21, %c0_22] : memref<1x256xf32, #tpu.memory_space<vmem>>, vector<1x256xf32>
    %28 = vector.broadcast %27 : vector<1x256xf32> to vector<16x256xf32>
    %29 = arith.addf %26, %28 : vector<16x256xf32>
    %30 = vector.extract_strided_slice %29 {offsets = [0, 0], sizes = [16, 128], strides = [1, 1]} : vector<16x256xf32> to vector<16x128xf32>
    %c0_23 = arith.constant 0 : index
    %c0_24 = arith.constant 0 : index
    %31 = vector.load %arg10[%c0_23, %c0_24] : memref<16x256xf32, #tpu.memory_space<vmem>>, vector<16x128xf32>
    tpu.vector_store %arg10[%c0_23, %c0_24], %30 {strides = array<i32>} : memref<16x256xf32, #tpu.memory_space<vmem>>, vector<16x128xf32>,
    %32 = vector.extract_strided_slice %29 {offsets = [0, 128], sizes = [16, 128], strides = [1, 1]} : vector<16x256xf32> to vector<16x128xf32>
    %cst_25 = arith.constant 0.000000e+00 : f32
    %33 = vector.broadcast %cst_25 : f32 to vector<16x128xf32>
    %34 = arith.maximumf %32, %33 : vector<16x128xf32>
    %35 = math.absf %32 : vector<16x128xf32>
    %cst_26 = arith.constant 0.000000e+00 : f32
    %36 = vector.broadcast %cst_26 : f32 to vector<16x128xf32>
    %37 = arith.subf %36, %35 : vector<16x128xf32>
    %38 = math.exp %37 : vector<16x128xf32>
    %39 = math.log1p %38 : vector<16x128xf32>
    %40 = arith.addf %34, %39 : vector<16x128xf32>
    %cst_27 = arith.constant 9.99999997E-7 : f32
    %41 = vector.broadcast %cst_27 : f32 to vector<16x128xf32>
    %42 = arith.addf %41, %40 : vector<16x128xf32>
    %c0_28 = arith.constant 0 : index
    %c128 = arith.constant 128 : index
    %43 = vector.load %arg10[%c0_28, %c128] : memref<16x256xf32, #tpu.memory_space<vmem>>, vector<16x128xf32>
    tpu.vector_store %arg10[%c0_28, %c128], %42 {strides = array<i32>} : memref<16x256xf32, #tpu.memory_space<vmem>>, vector<16x128xf32>,
    return
  }
  func.func @transform_0(%arg0: i32) -> (i32, i32) {
    %c0_i32 = arith.constant 0 : i32
    %c0_i32_0 = arith.constant 0 : i32
    return %arg0, %c0_i32 : i32, i32
  }
  func.func @transform_1(%arg0: i32) -> (i32, i32) {
    %c0_i32 = arith.constant 0 : i32
    %c0_i32_0 = arith.constant 0 : i32
    %c0_i32_1 = arith.constant 0 : i32
    return %c0_i32, %c0_i32_0 : i32, i32
  }
  func.func @transform_2(%arg0: i32) -> (i32, i32) {
    %c0_i32 = arith.constant 0 : i32
    %c0_i32_0 = arith.constant 0 : i32
    %c0_i32_1 = arith.constant 0 : i32
    return %c0_i32, %c0_i32_0 : i32, i32
  }
  func.func @transform_3(%arg0: i32) -> (i32, i32) {
    %c0_i32 = arith.constant 0 : i32
    %c0_i32_0 = arith.constant 0 : i32
    %c0_i32_1 = arith.constant 0 : i32
    return %c0_i32, %c0_i32_0 : i32, i32
  }
  func.func @transform_4(%arg0: i32) -> (i32, i32) {
    %c0_i32 = arith.constant 0 : i32
    %c0_i32_0 = arith.constant 0 : i32
    %c0_i32_1 = arith.constant 0 : i32
    return %c0_i32, %c0_i32_0 : i32, i32
  }
  func.func @transform_5(%arg0: i32) -> (i32, i32) {
    %c0_i32 = arith.constant 0 : i32
    %c0_i32_0 = arith.constant 0 : i32
    %c0_i32_1 = arith.constant 0 : i32
    return %c0_i32, %c0_i32_0 : i32, i32
  }
  func.func @transform_6(%arg0: i32) -> (i32, i32) {
    %c0_i32 = arith.constant 0 : i32
    %c0_i32_0 = arith.constant 0 : i32
    %c0_i32_1 = arith.constant 0 : i32
    return %c0_i32, %c0_i32_0 : i32, i32
  }
  func.func @transform_7(%arg0: i32) -> (i32, i32) {
    %c0_i32 = arith.constant 0 : i32
    %c0_i32_0 = arith.constant 0 : i32
    %c0_i32_1 = arith.constant 0 : i32
    return %c0_i32, %c0_i32_0 : i32, i32
  }
  func.func @transform_8(%arg0: i32) -> (i32, i32) {
    %c0_i32 = arith.constant 0 : i32
    %c0_i32_0 = arith.constant 0 : i32
    %c0_i32_1 = arith.constant 0 : i32
    return %c0_i32, %c0_i32_0 : i32, i32
  }
  func.func @transform_9(%arg0: i32) -> (i32, i32) {
    %c0_i32 = arith.constant 0 : i32
    %c0_i32_0 = arith.constant 0 : i32
    return %arg0, %c0_i32 : i32, i32
  }
}

</mosaic_0001>

<bundles_post_ra>
// kernel: prior_forward.1
= control target key start
LH: loop header
LB: loop body
LE: loop exit
PB: predicated region body
PF: predicated region fallthrough
CT: control target
= control target key end

     0   :  { %14 = vsyncpa [#allocation3], 0  ;;  %s1117_s0 = inlined_call_operand.vmem [shape: bf16[16,128], index: 0, kind: input, shape index: {}]   ;;  %s1118_s1 = inlined_call_operand.hbm [shape: bf16[128,128], index: 1, kind: input, shape index: {}]   ;;  %s1119_s2 = inlined_call_operand.vmem [shape: f32[1,128], index: 2, kind: input, shape index: {}]   ;;  %s1120_s3 = inlined_call_operand.hbm [shape: bf16[128,128], index: 3, kind: input, shape index: {}]   ;;  %s1121_s4 = inlined_call_operand.vmem [shape: f32[1,128], index: 4, kind: input, shape index: {}]   ;;  %s1122_s5 = inlined_call_operand.hbm [shape: bf16[128,128], index: 5, kind: input, shape index: {}]   ;;  %s1123_s6 = inlined_call_operand.vmem [shape: f32[1,128], index: 6, kind: input, shape index: {}]   ;;  %s1124_s7 = inlined_call_operand.hbm [shape: bf16[128,256], index: 7, kind: input, shape index: {}]   ;;  %s1125_s8 = inlined_call_operand.vmem [shape: f32[1,256], index: 8, kind: input, shape index: {}]   ;;  %s1126_s9 = inlined_call_operand.vmem [shape: f32[16,256], index: 9, kind: output, shape index: {}]  }
   0x1   :  { %15 = vsyncpa [#allocation5], 0 }
   0x2   :  { %16 = vsyncpa [#allocation8], 0  ;;  %s928_s30 = smov [#allocation4]   ;;  %s929_s11 = smov [#allocation2]  }
   0x3   :  { %s38_s10 = sshll.u32 %s928_s30, 4  ;;  %s24_s12 = sshll.u32 %s929_s11, 4  ;;  %s39_s10 = int_to_ptr.vmem [resolvable:$true] %s38_s10  ;;  %s989_s12 = int_to_ptr.vmem [resolvable:$true] %s24_s12 }
   0x4   :  { %s834_s15 = scalar_lea.hbm %s1120_s3, 1024 }
   0x5   :  { %p835_p0 = scmp.ne.s32.totalorder %s1120_s3, %s834_s15  ;;  %p838_p1 = scmp.lt.u32.totalorder %s834_s15, %s1120_s3 }
   0x7   :  { %p840_p2 = pnand %p838_p1, %p835_p0 }
   0x9   :  { %843 = shalt.err (!%p840_p2)
}
   0xa   :  { %s844_s20 = scalar_lea.vmem %s39_s10, 1024  ;;  %p849_p4 = scmp.lt.s32.totalorder %s39_s10, %s39_s10 }
   0xb   :  { %p845_p3 = scmp.ne.s32.totalorder %s39_s10, %s844_s20  ;;  %p850_p5 = scmp.lt.s32.totalorder %s844_s20, %s844_s20 }
   0xd   :  { %p851_p6 = por %p850_p5, %p849_p4 }
   0xf   :  { %p852_p7 = pnand %p851_p6, %p845_p3 }
  0x11   :  { %855 = shalt.err (!%p852_p7)
}
  0x12   :  { %s930_s21 = smov 64   ;;  %s931_s22 = smov 4  }
  0x13   :  { %44 = dma.hbm_to_vmem [thread:$0]  %s1120_s3, 1024, %s39_s10, [#allocation5], %s930_s21, %s930_s21, %s931_s22  }
  0x14   :  { %s856_s27 = scalar_lea.hbm %s1118_s1, 1024 }
  0x15   :  { %p857_p8 = scmp.ne.s32.totalorder %s1118_s1, %s856_s27  ;;  %p860_p9 = scmp.lt.u32.totalorder %s856_s27, %s1118_s1 }
  0x17   :  { %p862_p10 = pnand %p860_p9, %p857_p8 }
  0x19   :  { %865 = shalt.err (!%p862_p10)
}
  0x1a   :  { %s866_s13 = scalar_lea.vmem %s989_s12, 1024  ;;  %p871_p12 = scmp.lt.s32.totalorder %s989_s12, %s989_s12 }
  0x1b   :  { %p867_p11 = scmp.ne.s32.totalorder %s989_s12, %s866_s13  ;;  %p872_p13 = scmp.lt.s32.totalorder %s866_s13, %s866_s13 }
  0x1d   :  { %p873_p0 = por %p872_p13, %p871_p12 }
  0x1f   :  { %p874_p1 = pnand %p873_p0, %p867_p11 }
  0x21   :  { %877 = shalt.err (!%p874_p1)
}
  0x22   :  { %30 = dma.hbm_to_vmem [thread:$0]  %s1118_s1, 1024, %s989_s12, [#allocation3], %s930_s21, %s930_s21, %s931_s22  }
  0x23   :  { %s932_s14 = smov [#allocation6]   ;;  %s933_s16 = smov [#allocation7]  }
  0x24   :  { %s52_s15 = sshll.u32 %s932_s14, 4  ;;  %s66_s17 = sshll.u32 %s933_s16, 4  ;;  %s53_s15 = int_to_ptr.vmem [resolvable:$true] %s52_s15  ;;  %s1026_s17 = int_to_ptr.vmem [resolvable:$true] %s66_s17 }
  0x25   :  { %s878_s20 = scalar_lea.hbm %s1122_s5, 1024 }
  0x26   :  { %p879_p2 = scmp.ne.s32.totalorder %s1122_s5, %s878_s20  ;;  %p882_p3 = scmp.lt.u32.totalorder %s878_s20, %s1122_s5 }
  0x28   :  { %p884_p4 = pnand %p882_p3, %p879_p2 }
  0x2a   :  { %887 = shalt.err (!%p884_p4)
}
  0x2b   :  { %s888_s1 = scalar_lea.vmem %s53_s15, 1024  ;;  %p893_p6 = scmp.lt.s32.totalorder %s53_s15, %s53_s15 }
  0x2c   :  { %p889_p5 = scmp.ne.s32.totalorder %s53_s15, %s888_s1  ;;  %p894_p7 = scmp.lt.s32.totalorder %s888_s1, %s888_s1 }
  0x2e   :  { %p895_p8 = por %p894_p7, %p893_p6 }
  0x30   :  { %p896_p9 = pnand %p895_p8, %p889_p5 }
  0x32   :  { %899 = shalt.err (!%p896_p9)
}
  0x33   :  { %58 = dma.hbm_to_vmem [thread:$0]  %s1122_s5, 1024, %s53_s15, [#allocation5], %s930_s21, %s930_s21, %s931_s22  }
  0x34   :  { %s900_s30 = scalar_lea.hbm %s1124_s7, 2048 }
  0x35   :  { %p901_p10 = scmp.ne.s32.totalorder %s1124_s7, %s900_s30  ;;  %p904_p11 = scmp.lt.u32.totalorder %s900_s30, %s1124_s7 }
  0x37   :  { %p906_p12 = pnand %p904_p11, %p901_p10 }
  0x39   :  { %909 = shalt.err (!%p906_p12)
}
  0x3a   :  { %s910_s14 = scalar_lea.vmem %s1026_s17, 2048  ;;  %p915_p0 = scmp.lt.s32.totalorder %s1026_s17, %s1026_s17 }
  0x3b   :  { %p911_p13 = scmp.ne.s32.totalorder %s1026_s17, %s910_s14  ;;  %p916_p1 = scmp.lt.s32.totalorder %s910_s14, %s910_s14 }
  0x3d   :  { %p917_p2 = por %p916_p1, %p915_p0 }
  0x3f   :  { %p918_p3 = pnand %p917_p2, %p911_p13 }
  0x41   :  { %921 = shalt.err (!%p918_p3)
}
  0x42   :  { %s934_s5 = smov 128   ;;  %s935_s21 = smov 8  }
  0x43   :  { %72 = dma.hbm_to_vmem [thread:$0]  %s1124_s7, 2048, %s1026_s17, [#allocation8], %s934_s5, %s934_s5, %s935_s21  }
  0x44   :  { %922 = dma.done.wait [#allocation3], 1024  }
  0x45   :  { %923 = vsyncadd [#allocation3], 4294966272 }
  0x46   :  { %924 = dma.done.wait [#allocation5], 2048  }
  0x47   :  { %925 = vsyncadd [#allocation5], 4294965248 }
  0x48   :  { %926 = dma.done.wait [#allocation8], 2048  }
  0x49   :  { %927 = vsyncadd [#allocation8], 4294965248  ;;  %v936_v0 = vmov 0.0   ;;  %vm937_vm0 = vmmov 0   ;;  %v777_v1 = vld [vmem:[#allocation2] sm:$0xff]   ;;  %v778_v2 = vld [vmem:[#allocation2 + $0x8] sm:$0xff]  }
  0x4a   :  { %706 = vmatprep.subr.bf16.mxu0 %v936_v0  ;;  %722 = vmatprep.mubr.msk.bf16.mxu0 %vm937_vm0, %v936_v0  ;;  %v779_v3 = vld [vmem:[#allocation2 + $0x10] sm:$0xff]   ;;  %v786_v4 = vld [vmem:[#allocation4] sm:$0xff]   ;;  %v780_v5 = vld [vmem:[#allocation2 + $0x18] sm:$0xff]   ;;  %v938_v62 = vmov 0  }
  0x4b   :  { %726 = vmatprep.subr.bf16.mxu1 %v936_v0  ;;  %742 = vmatprep.mubr.msk.bf16.mxu1 %vm937_vm0, %v936_v0  ;;  %v787_v6 = vld [vmem:[#allocation4 + $0x8] sm:$0xff]   ;;  %v781_v7 = vld [vmem:[#allocation2 + $0x20] sm:$0xff]   ;;  %v788_v8 = vld [vmem:[#allocation4 + $0x10] sm:$0xff]  }
  0x4c   :  { %707 = vmatpush3.bf16.msra.mxu0 %v777_v1  ;;  %727 = vmatpush3.bf16.msra.mxu1 %v786_v4  ;;  %v782_v9 = vld [vmem:[#allocation2 + $0x28] sm:$0xff]   ;;  %v789_v10 = vld [vmem:[#allocation4 + $0x18] sm:$0xff]   ;;  %v783_v11 = vld [vmem:[#allocation2 + $0x30] sm:$0xff]  }
  0x4d   :  { %708 = vmatprep.subr.bf16.mxu0 %v936_v0  ;;  %728 = vmatprep.subr.bf16.mxu1 %v936_v0  ;;  %v790_v12 = vld [vmem:[#allocation4 + $0x20] sm:$0xff]   ;;  %v784_v13 = vld [vmem:[#allocation2 + $0x38] sm:$0xff]   ;;  %v791_v14 = vld [vmem:[#allocation4 + $0x28] sm:$0xff]  }
  0x4e   :  { %v785_v15 = vld [vmem:[%s1117_s0] sm:$0xff]   ;;  %v792_v16 = vld [vmem:[#allocation4 + $0x30] sm:$0xff]   ;;  %v794_v18 = vld [vmem:[#allocation6] sm:$0xff]  }
  0x4f   :  { %v793_v17 = vld [vmem:[#allocation4 + $0x38] sm:$0xff]   ;;  %v795_v19 = vld [vmem:[#allocation6 + $0x8] sm:$0xff]   ;;  %v796_v20 = vld [vmem:[#allocation6 + $0x10] sm:$0xff]  }
  0x50   :  { %709 = vmatpush3.bf16.msra.mxu0 %v778_v2  ;;  %729 = vmatpush3.bf16.msra.mxu1 %v787_v6  ;;  %v797_v21 = vld [vmem:[#allocation6 + $0x18] sm:$0xff]   ;;  %v798_v22 = vld [vmem:[#allocation6 + $0x20] sm:$0xff]   ;;  %v799_v23 = vld [vmem:[#allocation6 + $0x28] sm:$0xff]  }
  0x51   :  { %710 = vmatprep.subr.bf16.mxu0 %v936_v0  ;;  %730 = vmatprep.subr.bf16.mxu1 %v936_v0  ;;  %v635_v24 = vld [vmem:[%s1119_s2] ss:$0 sm:$0xff]  ;;  %v800_v34 = vld [vmem:[#allocation6 + $0x30] sm:$0xff]   ;;  %v802_v36 = vld [vmem:[#allocation7] ss:$8 sps:$4 sm:$0xff]  }
  0x52   :  { %v801_v35 = vld [vmem:[#allocation6 + $0x38] sm:$0xff]   ;;  %v804_v37 = vld [vmem:[#allocation7 + $0x4] ss:$8 sps:$4 sm:$0xff]   ;;  %v808_v41 = vld [vmem:[#allocation7 + $0x20] ss:$8 sps:$4 sm:$0xff]  }
  0x53   :  { %v807_v38 = vld [vmem:[#allocation7 + $0x14] ss:$8 sps:$4 sm:$0xff]   ;;  %v805_v39 = vld [vmem:[#allocation7 + $0x10] ss:$8 sps:$4 sm:$0xff]   ;;  %v810_v40 = vld [vmem:[#allocation7 + $0x24] ss:$8 sps:$4 sm:$0xff]  }
  0x54   :  { %711 = vmatpush3.bf16.msra.mxu0 %v779_v3  ;;  %731 = vmatpush3.bf16.msra.mxu1 %v788_v8  ;;  %v813_v42 = vld [vmem:[#allocation7 + $0x34] ss:$8 sps:$4 sm:$0xff]   ;;  %v811_v43 = vld [vmem:[#allocation7 + $0x30] ss:$8 sps:$4 sm:$0xff]   ;;  %v816_v44 = vld [vmem:[#allocation7 + $0x44] ss:$8 sps:$4 sm:$0xff]  }
  0x55   :  { %712 = vmatprep.subr.bf16.mxu0 %v936_v0  ;;  %732 = vmatprep.subr.bf16.mxu1 %v936_v0  ;;  %v814_v45 = vld [vmem:[#allocation7 + $0x40] ss:$8 sps:$4 sm:$0xff]   ;;  %v819_v46 = vld [vmem:[#allocation7 + $0x54] ss:$8 sps:$4 sm:$0xff]   ;;  %v817_v47 = vld [vmem:[#allocation7 + $0x50] ss:$8 sps:$4 sm:$0xff]  }
  0x56   :  { %v645_v48 = vld [vmem:[%s1121_s4] ss:$0 sm:$0xff]  ;;  %v822_v58 = vld [vmem:[#allocation7 + $0x64] ss:$8 sps:$4 sm:$0xff]   ;;  %v820_v59 = vld [vmem:[#allocation7 + $0x60] ss:$8 sps:$4 sm:$0xff]  }
  0x57   :  { %v825_v60 = vld [vmem:[#allocation7 + $0x74] ss:$8 sps:$4 sm:$0xff]   ;;  %v823_v61 = vld [vmem:[#allocation7 + $0x70] ss:$8 sps:$4 sm:$0xff]  }
  0x58   :  { %713 = vmatpush3.bf16.msra.mxu0 %v780_v5  ;;  %733 = vmatpush3.bf16.msra.mxu1 %v789_v10  ;;  %v654_v63 = vld [vmem:[%s1123_s6] ss:$0 sm:$0xff] }
  0x59   :  { %714 = vmatprep.subr.bf16.mxu0 %v936_v0  ;;  %734 = vmatprep.subr.bf16.mxu1 %v936_v0 }
  0x5c   :  { %715 = vmatpush3.bf16.msra.mxu0 %v781_v7  ;;  %735 = vmatpush3.bf16.msra.mxu1 %v790_v12  ;;  %v457_v12 = vld [vmem:[%s1125_s8] sm:$0x3] }
  0x5d   :  { %716 = vmatprep.subr.bf16.mxu0 %v936_v0  ;;  %736 = vmatprep.subr.bf16.mxu1 %v936_v0 }
  0x60   :  { %717 = vmatpush3.bf16.msra.mxu0 %v782_v9  ;;  %737 = vmatpush3.bf16.msra.mxu1 %v791_v14  ;;  %v459_v9 = vlaneseq }
  0x61   :  { %718 = vmatprep.subr.bf16.mxu0 %v936_v0  ;;  %738 = vmatprep.subr.bf16.mxu1 %v936_v0 }
  0x62   :  { %v460_v10 = vshrl.u32 %v459_v9, 7 }
  0x64   :  { %719 = vmatpush3.bf16.msra.mxu0 %v783_v11  ;;  %739 = vmatpush3.bf16.msra.mxu1 %v792_v16  ;;  %v461_v11 = vsub.s32 0, %v460_v10 }
  0x65   :  { %720 = vmatprep.subr.bf16.mxu0 %v936_v0  ;;  %740 = vmatprep.subr.bf16.mxu1 %v936_v0 }
  0x66   :  { %v462_v14 = vrot.slane %v457_v12, %v461_v11 }
  0x68   :  { %721 = vmatpush3.bf16.msra.mxu0 %v784_v13  ;;  %741 = vmatpush3.bf16.msra.mxu1 %v793_v17  ;;  %v465_v13 = vsub.s32 1, %v460_v10 }
  0x69   :  { %746 = vmatprep.subr.bf16.mxu0 %v936_v0  ;;  %549 = vmatprep.subr.bf16.mxu1 %v804_v37 }
  0x6b   :  { %723 = vmatmul.mubr.bf16.vlgmr.msra.gmra.mrb[0].mxu0 %v785_v15  ;;  %v466_v15 = vrot.slane %v457_v12, %v465_v13 }
  0x6c   :  { %762 = vmatprep.mubr.msk.bf16.mxu0 %vm937_vm0, %v936_v0  ;;  %747 = vmatpush3.bf16.msra.mxu0 %v794_v18 }
  0x6d   :  { %748 = vmatprep.subr.bf16.mxu0 %v936_v0 }
  0x70   :  { %749 = vmatpush3.bf16.msra.mxu0 %v795_v19 }
  0x71   :  { %750 = vmatprep.subr.bf16.mxu0 %v936_v0 }
  0x74   :  { %751 = vmatpush3.bf16.msra.mxu0 %v796_v20 }
  0x75   :  { %752 = vmatprep.subr.bf16.mxu0 %v936_v0 }
  0x78   :  { %753 = vmatpush3.bf16.msra.mxu0 %v797_v21 }
  0x79   :  { %754 = vmatprep.subr.bf16.mxu0 %v936_v0 }
  0x7c   :  { %755 = vmatpush3.bf16.msra.mxu0 %v798_v22 }
  0x7d   :  { %756 = vmatprep.subr.bf16.mxu0 %v936_v0 }
  0x80   :  { %757 = vmatpush3.bf16.msra.mxu0 %v799_v23 }
  0x81   :  { %758 = vmatprep.subr.bf16.mxu0 %v936_v0 }
  0x84   :  { %759 = vmatpush3.bf16.msra.mxu0 %v800_v34 }
  0x85   :  { %760 = vmatprep.subr.bf16.mxu0 %v936_v0 }
  0x88   :  { %761 = vmatpush3.bf16.msra.mxu0 %v801_v35 }
 0x13e   :  { %v201_v25 = vpop.f32.mrb[0].mxu0 }
 0x13f   :  { %v202_v26 = vadd.f32 %v635_v24, %v201_v25  ;;  %v724_v27 = vpop.f32.mrb[1].mxu0 }
 0x140   :  { %v204_v28 = vpop.f32.mrb[2].mxu0 }
 0x141   :  { %v205_v29 = vadd.f32 %v635_v24, %v204_v28  ;;  %v725_v30 = vpop.f32.mrb[3].mxu0  ;;  %v208_v31 = vmax.f32 %v202_v26, 0.0 }
 0x143   :  { %v209_v32 = vmax.f32 %v205_v29, 0.0 }
 0x145   :  { %v210_v33 = vpack.c.bf16 %v209_v32, %v208_v31 }
 0x147   :  { %743 = vmatmul.mubr.bf16.vlgmr.msra.gmra.mrb[0].mxu1 %v210_v33 }
 0x148   :  { %550 = vmatpush1.bf16.msra.mxu1 %v802_v36  ;;  %581 = vmatprep.mubr.bf16.mxu1 %v938_v62 }
 0x149   :  { %551 = vmatprep.subr.bf16.mxu1 %v807_v38 }
 0x14c   :  { %552 = vmatpush1.bf16.msra.mxu1 %v805_v39 }
 0x14d   :  { %553 = vmatprep.subr.bf16.mxu1 %v810_v40 }
 0x150   :  { %554 = vmatpush1.bf16.msra.mxu1 %v808_v41 }
 0x151   :  { %555 = vmatprep.subr.bf16.mxu1 %v813_v42 }
 0x154   :  { %556 = vmatpush1.bf16.msra.mxu1 %v811_v43 }
 0x155   :  { %557 = vmatprep.subr.bf16.mxu1 %v816_v44 }
 0x158   :  { %558 = vmatpush1.bf16.msra.mxu1 %v814_v45 }
 0x159   :  { %559 = vmatprep.subr.bf16.mxu1 %v819_v46 }
 0x15c   :  { %560 = vmatpush1.bf16.msra.mxu1 %v817_v47 }
 0x15d   :  { %561 = vmatprep.subr.bf16.mxu1 %v822_v58 }
 0x160   :  { %562 = vmatpush1.bf16.msra.mxu1 %v820_v59 }
 0x161   :  { %563 = vmatprep.subr.bf16.mxu1 %v825_v60 }
 0x164   :  { %564 = vmatpush1.bf16.msra.mxu1 %v823_v61 }
 0x21a   :  { %v316_v49 = vpop.f32.mrb[0].mxu1 }
 0x21b   :  { %v317_v50 = vadd.f32 %v645_v48, %v316_v49  ;;  %v744_v51 = vpop.f32.mrb[1].mxu1 }
 0x21c   :  { %v319_v52 = vpop.f32.mrb[2].mxu1 }
 0x21d   :  { %v320_v53 = vadd.f32 %v645_v48, %v319_v52  ;;  %v745_v54 = vpop.f32.mrb[3].mxu1  ;;  %v323_v55 = vmax.f32 %v317_v50, 0.0 }
 0x21f   :  { %v324_v56 = vmax.f32 %v320_v53, 0.0 }
 0x221   :  { %v325_v57 = vpack.c.bf16 %v324_v56, %v323_v55 }
 0x223   :  { %763 = vmatmul.mubr.bf16.vlgmr.msra.gmra.mrb[4].mxu0 %v325_v57 }
 0x2f6   :  { %v431_v0 = vpop.f32.mrb[4].mxu0 }
 0x2f7   :  { %v432_v1 = vadd.f32 %v654_v63, %v431_v0  ;;  %v764_v2 = vpop.f32.mrb[5].mxu0 }
 0x2f8   :  { %v434_v3 = vpop.f32.mrb[6].mxu0 }
 0x2f9   :  { %v435_v4 = vadd.f32 %v654_v63, %v434_v3  ;;  %v765_v5 = vpop.f32.mrb[7].mxu0  ;;  %v438_v6 = vmax.f32 %v432_v1, 0.0 }
 0x2fb   :  { %v439_v7 = vmax.f32 %v435_v4, 0.0 }
 0x2fd   :  { %v440_v8 = vpack.c.bf16 %v439_v7, %v438_v6 }
 0x2ff   :  { %582 = vmatmul.mubr.bf16.vlgmr.msra.gmra.mrb[4].mxu1 %v440_v8 }
 0x3d2   :  { %v583_v16 = vpop.f32.mrb[4].mxu1 }
 0x3d3   :  { %v584_v17 = vadd.f32 %v583_v16, %v462_v14  ;;  %v585_v18 = vpop.f32.mrb[5].mxu1 }
 0x3d4   :  { %v586_v19 = vadd.f32 %v585_v18, %v466_v15  ;;  %v587_v20 = vpop.f32.mrb[6].mxu1 }
 0x3d5   :  { %592 = vst [vmem:[%s1126_s9] sm:$0xff] %v584_v17  ;;  %v588_v21 = vadd.f32 %v587_v20, %v462_v14  ;;  %v589_v22 = vpop.f32.mrb[7].mxu1 }
 0x3d6   :  { %v596_v23 = vand.u32 2147483647, %v586_v19  ;;  %v590_v24 = vadd.f32 %v589_v22, %v466_v15  ;;  %v594_v44 = vmax.f32 %v586_v19, 0.0 }
 0x3d7   :  { %593 = vst [vmem:[%s1126_s9 + $0x10] sm:$0xff] %v588_v21 }
 0x3d8   :  { %v598_v25 = vsub.f32 0.0, %v596_v23  ;;  %v597_v26 = vand.u32 2147483647, %v590_v24  ;;  %v595_v49 = vmax.f32 %v590_v24, 0.0 }
 0x3da   :  { %v600_v27 = vmul.f32 1.442695, %v598_v25  ;;  %v599_v28 = vsub.f32 0.0, %v597_v26 }
 0x3dc   :  { %826 = vpow2.f32 %v600_v27  ;;  %v602_v29 = vmul.f32 1.442695, %v599_v28 }
 0x3de   :  { %828 = vpow2.f32 %v602_v29 }
 0x3e6   :  { %v827_v30 = vpop.eup %826 }
 0x3e7   :  { %v604_v31 = vadd.f32 1.0, %v827_v30  ;;  %v607_v34 = vmul.f32 -0.5, %v827_v30  ;;  %v610_v37 = vand.u32 2147483647, %v827_v30 }
 0x3e8   :  { %v829_v32 = vpop.eup %828 }
 0x3e9   :  { %830 = vlog2.f32 %v604_v31  ;;  %v613_v33 = vadd.f32 1.0, %v829_v32  ;;  %v616_v35 = vmul.f32 -0.5, %v829_v32  ;;  %v608_v36 = vadd.f32 1.0, %v607_v34 }
 0x3ea   :  { %v619_v40 = vand.u32 2147483647, %v829_v32  ;;  %vm611_vm1 = vcmp.lt.f32.partialorder %v610_v37, 0.0004427343 }
 0x3eb   :  { %832 = vlog2.f32 %v613_v33  ;;  %v617_v38 = vadd.f32 1.0, %v616_v35  ;;  %v609_v42 = vmul.f32 %v827_v30, %v608_v36 }
 0x3ec   :  { %vm620_vm2 = vcmp.lt.f32.partialorder %v619_v40, 0.0004427343 }
 0x3ed   :  { %v618_v47 = vmul.f32 %v829_v32, %v617_v38 }
 0x3f3   :  { %v831_v39 = vpop.eup %830 }
 0x3f4   :  { %v606_v41 = vmul.f32 0.6931472, %v831_v39 }
 0x3f5   :  { %v833_v43 = vpop.eup %832 }
 0x3f6   :  { %v612_v45 = vsel %vm611_vm1, %v609_v42, %v606_v41  ;;  %v615_v46 = vmul.f32 0.6931472, %v833_v43 }
 0x3f7   :  { %v622_v48 = vadd.f32 %v612_v45, %v594_v44 }
 0x3f8   :  { %v621_v50 = vsel %vm620_vm2, %v618_v47, %v615_v46 }
 0x3f9   :  { %v624_v51 = vadd.f32 1e-06, %v622_v48  ;;  %v623_v52 = vadd.f32 %v621_v50, %v595_v49 }
 0x3fb   :  { %626 = vst [vmem:[%s1126_s9 + $0x8] sm:$0xff] %v624_v51  ;;  %v625_v53 = vadd.f32 1e-06, %v623_v52 }
 0x3fd   :  { %627 = vst [vmem:[%s1126_s9 + $0x18] sm:$0xff] %v625_v53 }
 0x3fe   :  { %632 = vsyncpa [#allocation3], 1 }
 0x3ff   :  { %633 = vsyncpa [#allocation5], 1 }
 0x400   :  { %634 = vsyncpa [#allocation8], 1 }

</bundles_post_ra>
